<compile_context>
chip_gen: v7x
topology: tpu7x:2x2x1
jax: 0.10.0
libtpu: 0.0.40
codegen_flags: <defaults>
</compile_context>

<pallas_src>
import functools

import jax
import jax.numpy as jnp
from jax.experimental import pallas as pl
from jax.experimental.pallas import tpu as pltpu


_MIN_GRID_STEPS = 4                          # >= 2 steps per TC on v7x (2 TCs)
_TARGET_STEP_INPUT_BYTES = 4 * 1024 * 1024   # ~2-8 MiB/step amortizes ~0.35us/step


def _cdiv(a, b):
    return -(-a // b)


def _round_up(a, b):
    return _cdiv(a, b) * b


def _vmem_budgets():
    """Returns (tile_budget_bytes, vmem_limit_bytes), generation aware."""
    try:
        cap = pltpu.get_tpu_info().vmem_capacity_bytes
    except Exception:
        cap = 64 * 1024 * 1024               # be conservative (assume v7x)
    if cap <= 64 * 1024 * 1024:              # v7x: 64 MiB physical VMEM
        return 14 * 1024 * 1024, 30 * 1024 * 1024
    return 24 * 1024 * 1024, 64 * 1024 * 1024   # v5e / v6e: 128 MiB physical


def _pick_tile_rows(rows, lane_features, itemsize, tile_budget):
    """Largest byte-sized row tile within the VMEM budget, >=4 steps when possible."""
    align = max(8, 32 // itemsize)           # 8 f32, 16 bf16, 32 int8/fp8 rows
    # VMEM per row: double-buffered in+out tiles plus f32 upcast/intermediates.
    per_row = 2 * 2 * lane_features * itemsize + 4 * lane_features * 4
    cap = max(align, (tile_budget // per_row) // align * align)
    # Size the step by bytes: target ~4 MiB of input per grid step.
    target = max(align, _round_up(_cdiv(_TARGET_STEP_INPUT_BYTES,
                                        lane_features * itemsize), align))
    tile = min(cap, target)
    # Keep >= _MIN_GRID_STEPS grid steps (2 per v7x TensorCore) when there is
    # enough work, so prefetch/writeback overlap on both cores.
    if rows >= _MIN_GRID_STEPS * align:
        per_step = max(align, (_cdiv(rows, _MIN_GRID_STEPS) // align) * align)
        tile = min(tile, per_step)
    if tile >= rows:
        return rows                          # single full-extent block (always legal)
    return tile


def _layernorm_kernel(x_ref, gamma_ref, beta_ref, o_ref, *, eps, features):
    """Standard path: the feature dim is the lane dim (F >= 128 or unpackable)."""
    x = x_ref[...].astype(jnp.float32)                       # (R, F)
    mean = jnp.sum(x, axis=-1, keepdims=True) * (1.0 / features)
    diff = x - mean
    # torch.std is the unbiased estimator (divide by N-1), NOT N.
    var = jnp.sum(diff * diff, axis=-1, keepdims=True) * (1.0 / (features - 1))
    inv = 1.0 / (jnp.sqrt(var) + eps)        # exact divide; free at HBM roofline
    gamma = gamma_ref[...].astype(jnp.float32)               # (1, F)
    beta = beta_ref[...].astype(jnp.float32)                 # (1, F)
    o_ref[...] = (gamma * (diff * inv) + beta).astype(o_ref.dtype)


def _layernorm_packed_kernel(x_ref, gamma_ref, beta_ref, seg_ref, segt_ref,
                             o_ref, *, eps, features):
    """Lane-packed path: G=128//F rows per 128-lane row, segment matmuls on MXU."""
    x = x_ref[...].astype(jnp.float32)                       # (R, G*F) lane-dense
    seg = seg_ref[...]                                       # (G*F, G) 0/1 segments
    segt = segt_ref[...]                                     # (G, G*F)
    hi = jax.lax.Precision.HIGHEST
    seg_sum = jnp.dot(x, seg, precision=hi,
                      preferred_element_type=jnp.float32)    # (R, G)
    mean = seg_sum * (1.0 / features)
    diff = x - jnp.dot(mean, segt, precision=hi,
                       preferred_element_type=jnp.float32)   # broadcast back
    sq = jnp.dot(diff * diff, seg, precision=hi,
                 preferred_element_type=jnp.float32)         # (R, G)
    inv = 1.0 / (jnp.sqrt(sq * (1.0 / (features - 1))) + eps)   # exact, per segment
    inv_b = jnp.dot(inv, segt, precision=hi,
                    preferred_element_type=jnp.float32)      # (R, G*F)
    gamma = gamma_ref[...].astype(jnp.float32)               # (1, G*F) = a_2 tiled
    beta = beta_ref[...].astype(jnp.float32)
    o_ref[...] = (gamma * (diff * inv_b) + beta).astype(o_ref.dtype)


def layernorm(x, a_2, b_2, eps=1e-6):
    """LayerNorm over the last axis; any number of leading dims."""
    orig_shape = x.shape
    features = orig_shape[-1]
    rows = 1
    for d in orig_shape[:-1]:
        rows *= d
    x2d = x.reshape(rows, features)
    itemsize = x2d.dtype.itemsize

    tile_budget, vmem_limit = _vmem_budgets()

    # Lane packing for narrow feature dims: fold G = 128//F rows into one
    # lane-dense 128-lane row so loads/stores are unmasked.
    pack = 1
    if 1 < features < 128 and 128 % features == 0:
        g = 128 // features
        if rows % g == 0:
            pack = g
    # TODO(synk): lane-pack the F<128 case when rows % (128//F) != 0 or when
    # 128 % F != 0 (needs a ragged / partial packing scheme).

    if pack > 1:
        rows_p = rows // pack
        lane_f = pack * features
        x_in = x2d.reshape(rows_p, lane_f)                   # free row-major view
        gamma = jnp.tile(a_2.reshape(-1), pack).reshape(1, lane_f)
        beta = jnp.tile(b_2.reshape(-1), pack).reshape(1, lane_f)
        lane_idx = jnp.arange(lane_f, dtype=jnp.int32)
        seg = (lane_idx[:, None] // features
               == jnp.arange(pack, dtype=jnp.int32)[None, :]).astype(jnp.float32)
        segt = jnp.transpose(seg)
    else:
        rows_p = rows
        lane_f = features
        x_in = x2d
        gamma = a_2.reshape(1, features)
        beta = b_2.reshape(1, features)

    tile_rows = _pick_tile_rows(rows_p, lane_f, itemsize, tile_budget)
    grid = _cdiv(rows_p, tile_rows)   # ragged last block handled by Pallas

    if pack > 1:
        kernel = functools.partial(_layernorm_packed_kernel, eps=eps,
                                   features=features)
        in_specs = [
            pl.BlockSpec((tile_rows, lane_f), lambda i: (i, 0)),
            pl.BlockSpec((1, lane_f), lambda i: (0, 0)),
            pl.BlockSpec((1, lane_f), lambda i: (0, 0)),
            pl.BlockSpec((lane_f, pack), lambda i: (0, 0)),
            pl.BlockSpec((pack, lane_f), lambda i: (0, 0)),
        ]
        args = (x_in, gamma, beta, seg, segt)
    else:
        kernel = functools.partial(_layernorm_kernel, eps=eps,
                                   features=features)
        in_specs = [
            pl.BlockSpec((tile_rows, lane_f), lambda i: (i, 0)),
            pl.BlockSpec((1, lane_f), lambda i: (0, 0)),
            pl.BlockSpec((1, lane_f), lambda i: (0, 0)),
        ]
        args = (x_in, gamma, beta)

    out = pl.pallas_call(
        kernel,
        out_shape=jax.ShapeDtypeStruct((rows_p, lane_f), x.dtype),
        grid_spec=pltpu.PrefetchScalarGridSpec(
            num_scalar_prefetch=0,
            grid=(grid,),
            in_specs=in_specs,
            out_specs=pl.BlockSpec((tile_rows, lane_f), lambda i: (i, 0)),
        ),
        compiler_params=pltpu.CompilerParams(
            dimension_semantics=("parallel",),
            vmem_limit_bytes=int(vmem_limit),
        ),
    )(*args)

    return out.reshape(orig_shape)


def _reference(x, a_2, b_2, eps):
    """Pure-JAX reference (unbiased std, std + eps, like the torch module)."""
    features = x.shape[-1]
    mean = jnp.mean(x, axis=-1, keepdims=True)
    std = jnp.sqrt(jnp.sum((x - mean) ** 2, axis=-1, keepdims=True) / (features - 1))
    return a_2 * (x - mean) / (std + eps) + b_2


if __name__ == "__main__":
    key = jax.random.PRNGKey(0)

    # Primary check: shapes implied by the module (lane-packed path, F=32 < 128).
    batch, seq, hidden = 2, 8, 32
    x = jax.random.normal(key, (batch, seq, hidden), dtype=jnp.float32)
    a_2 = jnp.ones((hidden,), dtype=jnp.float32)     # nn.Parameter(torch.ones)
    b_2 = jnp.zeros((hidden,), dtype=jnp.float32)    # nn.Parameter(torch.zeros)

    out = layernorm(x, a_2, b_2, eps=1e-6)
    jax.block_until_ready(out)
    ref = _reference(x, a_2, b_2, 1e-6)
    assert jnp.allclose(out, ref, atol=1e-4, rtol=1e-4), "packed path mismatch"

    # Secondary check: standard path (F >= 128) with a ragged last row-block,
    # exercising the no-host-padding path.
    k2 = jax.random.PRNGKey(1)
    x2 = jax.random.normal(k2, (5, 13, 256), dtype=jnp.float32)
    a2 = jnp.ones((256,), dtype=jnp.float32)
    b2 = jnp.zeros((256,), dtype=jnp.float32)
    out2 = layernorm(x2, a2, b2, eps=1e-6)
    jax.block_until_ready(out2)
    ref2 = _reference(x2, a2, b2, 1e-6)
    assert jnp.allclose(out2, ref2, atol=1e-4, rtol=1e-4), "standard path mismatch"

    print("KERNEL_OK")
</pallas_src>

<mosaic_0001>
module attributes {stable_mosaic.version = 11 : i64} {
  func.func @_layernorm_packed_kernel(%arg0: i32, %arg1: memref<4x128xf32, #tpu.memory_space<vmem>>, %arg2: memref<1x128xf32, #tpu.memory_space<vmem>>, %arg3: memref<1x128xf32, #tpu.memory_space<vmem>>, %arg4: memref<128x4xf32, #tpu.memory_space<vmem>>, %arg5: memref<4x128xf32, #tpu.memory_space<vmem>>, %arg6: memref<4x128xf32, #tpu.memory_space<vmem>>) attributes {dimension_semantics = [#tpu.dimension_semantics<parallel>], iteration_bounds = array<i64: 1>, scalar_prefetch = 0 : i64, scratch_operands = 0 : i64, tpu.core_type = #tpu.core_type<tc>, window_params = [{transform_indices = @transform_0, window_bounds = array<i64: 4, 128>}, {pipeline_mode = #tpu.pipeline_mode<synchronous>, transform_indices = @transform_1, window_bounds = array<i64: 1, 128>}, {pipeline_mode = #tpu.pipeline_mode<synchronous>, transform_indices = @transform_2, window_bounds = array<i64: 1, 128>}, {pipeline_mode = #tpu.pipeline_mode<synchronous>, transform_indices = @transform_3, window_bounds = array<i64: 128, 4>}, {pipeline_mode = #tpu.pipeline_mode<synchronous>, transform_indices = @transform_4, window_bounds = array<i64: 4, 128>}, {transform_indices = @transform_5, window_bounds = array<i64: 4, 128>}]} {
    %c0 = arith.constant 0 : index
    %c0_0 = arith.constant 0 : index
    %0 = vector.load %arg1[%c0, %c0_0] : memref<4x128xf32, #tpu.memory_space<vmem>>, vector<4x128xf32>
    %c0_1 = arith.constant 0 : index
    %c0_2 = arith.constant 0 : index
    %1 = vector.load %arg4[%c0_1, %c0_2] : memref<128x4xf32, #tpu.memory_space<vmem>>, vector<128x4xf32>
    %c0_3 = arith.constant 0 : index
    %c0_4 = arith.constant 0 : index
    %2 = vector.load %arg5[%c0_3, %c0_4] : memref<4x128xf32, #tpu.memory_space<vmem>>, vector<4x128xf32>
    %cst = arith.constant dense<0.000000e+00> : vector<4x4xf32>
    %3 = tpu.matmul %0, %1, %cst {dimension_numbers = #tpu.dot_dimension_numbers<[1], [0], [0], [1], [0, 0, 1, 1], [], []>, precision = #tpu.contract_precision<fp32>} : vector<4x128xf32>, vector<128x4xf32>, vector<4x4xf32> -> vector<4x4xf32>
    %cst_5 = arith.constant 3.125000e-02 : f32
    %4 = vector.broadcast %cst_5 : f32 to vector<4x4xf32>
    %5 = arith.mulf %3, %4 : vector<4x4xf32>
    %cst_6 = arith.constant dense<0.000000e+00> : vector<4x128xf32>
    %6 = tpu.matmul %5, %2, %cst_6 {dimension_numbers = #tpu.dot_dimension_numbers<[1], [0], [0], [1], [0, 0, 1, 1], [], []>, precision = #tpu.contract_precision<fp32>} : vector<4x4xf32>, vector<4x128xf32>, vector<4x128xf32> -> vector<4x128xf32>
    %7 = arith.subf %0, %6 : vector<4x128xf32>
    %8 = arith.mulf %7, %7 : vector<4x128xf32>
    %cst_7 = arith.constant dense<0.000000e+00> : vector<4x4xf32>
    %9 = tpu.matmul %8, %1, %cst_7 {dimension_numbers = #tpu.dot_dimension_numbers<[1], [0], [0], [1], [0, 0, 1, 1], [], []>, precision = #tpu.contract_precision<fp32>} : vector<4x128xf32>, vector<128x4xf32>, vector<4x4xf32> -> vector<4x4xf32>
    %cst_8 = arith.constant 0.0322580636 : f32
    %10 = vector.broadcast %cst_8 : f32 to vector<4x4xf32>
    %11 = arith.mulf %9, %10 : vector<4x4xf32>
    %12 = math.sqrt %11 : vector<4x4xf32>
    %cst_9 = arith.constant 9.99999997E-7 : f32
    %13 = vector.broadcast %cst_9 : f32 to vector<4x4xf32>
    %14 = arith.addf %12, %13 : vector<4x4xf32>
    %cst_10 = arith.constant 1.000000e+00 : f32
    %15 = vector.broadcast %cst_10 : f32 to vector<4x4xf32>
    %16 = arith.divf %15, %14 : vector<4x4xf32>
    %cst_11 = arith.constant dense<0.000000e+00> : vector<4x128xf32>
    %17 = tpu.matmul %16, %2, %cst_11 {dimension_numbers = #tpu.dot_dimension_numbers<[1], [0], [0], [1], [0, 0, 1, 1], [], []>, precision = #tpu.contract_precision<fp32>} : vector<4x4xf32>, vector<4x128xf32>, vector<4x128xf32> -> vector<4x128xf32>
    %c0_12 = arith.constant 0 : index
    %c0_13 = arith.constant 0 : index
    %18 = vector.load %arg2[%c0_12, %c0_13] : memref<1x128xf32, #tpu.memory_space<vmem>>, vector<1x128xf32>
    %c0_14 = arith.constant 0 : index
    %c0_15 = arith.constant 0 : index
    %19 = vector.load %arg3[%c0_14, %c0_15] : memref<1x128xf32, #tpu.memory_space<vmem>>, vector<1x128xf32>
    %20 = arith.mulf %7, %17 : vector<4x128xf32>
    %21 = vector.broadcast %18 : vector<1x128xf32> to vector<4x128xf32>
    %22 = arith.mulf %21, %20 : vector<4x128xf32>
    %23 = vector.broadcast %19 : vector<1x128xf32> to vector<4x128xf32>
    %24 = arith.addf %22, %23 : vector<4x128xf32>
    %c0_16 = arith.constant 0 : index
    %c0_17 = arith.constant 0 : index
    %25 = vector.load %arg6[%c0_16, %c0_17] : memref<4x128xf32, #tpu.memory_space<vmem>>, vector<4x128xf32>
    tpu.vector_store %arg6[%c0_16, %c0_17], %24 {strides = array<i32>} : memref<4x128xf32, #tpu.memory_space<vmem>>, vector<4x128xf32>,
    return
  }
  func.func @transform_0(%arg0: i32) -> (i32, i32) {
    %c0_i32 = arith.constant 0 : i32
    %c0_i32_0 = arith.constant 0 : i32
    return %arg0, %c0_i32 : i32, i32
  }
  func.func @transform_1(%arg0: i32) -> (i32, i32) {
    %c0_i32 = arith.constant 0 : i32
    %c0_i32_0 = arith.constant 0 : i32
    %c0_i32_1 = arith.constant 0 : i32
    return %c0_i32, %c0_i32_0 : i32, i32
  }
  func.func @transform_2(%arg0: i32) -> (i32, i32) {
    %c0_i32 = arith.constant 0 : i32
    %c0_i32_0 = arith.constant 0 : i32
    %c0_i32_1 = arith.constant 0 : i32
    return %c0_i32, %c0_i32_0 : i32, i32
  }
  func.func @transform_3(%arg0: i32) -> (i32, i32) {
    %c0_i32 = arith.constant 0 : i32
    %c0_i32_0 = arith.constant 0 : i32
    %c0_i32_1 = arith.constant 0 : i32
    return %c0_i32, %c0_i32_0 : i32, i32
  }
  func.func @transform_4(%arg0: i32) -> (i32, i32) {
    %c0_i32 = arith.constant 0 : i32
    %c0_i32_0 = arith.constant 0 : i32
    %c0_i32_1 = arith.constant 0 : i32
    return %c0_i32, %c0_i32_0 : i32, i32
  }
  func.func @transform_5(%arg0: i32) -> (i32, i32) {
    %c0_i32 = arith.constant 0 : i32
    %c0_i32_0 = arith.constant 0 : i32
    return %arg0, %c0_i32 : i32, i32
  }
}

</mosaic_0001>

<bundles_post_ra>
// kernel: tpu_custom_call.1
= control target key start
LH: loop header
LB: loop body
LE: loop exit
PB: predicated region body
PF: predicated region fallthrough
CT: control target
= control target key end

     0   :  { %v3340_v3 = vmov 0.0|0.0   ;;  %vm3341_vm0 = vmmov 0   ;;  %v3342_v8 = vmov 0.0   ;;  %s3899_s0 = inlined_call_operand.vmem [shape: f32[4,128], index: 0, kind: input, shape index: {}]   ;;  %s3900_s1 = inlined_call_operand.vmem [shape: f32[1,128], index: 1, kind: input, shape index: {}]   ;;  %s3901_s2 = inlined_call_operand.vmem [shape: f32[1,128], index: 2, kind: input, shape index: {}]   ;;  %s3902_s3 = inlined_call_operand.vmem [shape: f32[128,4], index: 3, kind: input, shape index: {}]   ;;  %s3903_s4 = inlined_call_operand.vmem [shape: f32[4,128], index: 4, kind: input, shape index: {}]   ;;  %s3904_s5 = inlined_call_operand.hbm [shape: f32[4,128], index: 5, kind: output, shape index: {}]  }
   0x1   :  { %v22_v0 = vld [vmem:[%s3902_s3] sm:$0xff]  ;;  %v23_v1 = vld [vmem:[%s3902_s3 + $0x8] sm:$0xff]  ;;  %v24_v2 = vld [vmem:[%s3902_s3 + $0x10] sm:$0xff]  ;;  %2980 = vmatprep.subr.bf16.mxu0 %v3340_v3  ;;  %2532 = vmatprep.mubr.msk.f32.mxu0 %vm3341_vm0, %v3342_v8 }
   0x2   :  { %v40_v4 = vand.u32 4294901760, %v22_v0  ;;  %v43_v5 = vand.u32 4294901760, %v23_v1  ;;  %v25_v6 = vld [vmem:[%s3902_s3 + $0x18] sm:$0xff]  ;;  %v46_v7 = vand.u32 4294901760, %v24_v2  ;;  %v26_v10 = vld [vmem:[%s3902_s3 + $0x20] sm:$0xff]  ;;  %v27_v11 = vld [vmem:[%s3902_s3 + $0x28] sm:$0xff]  ;;  %2710 = vmatprep.subr.mxu1 %v3342_v8  ;;  %2712 = vmatprep.mubr.msk.f32.mxu1 %vm3341_vm0, %v3342_v8 }
   0x3   :  { %v49_v9 = vand.u32 4294901760, %v25_v6  ;;  %v52_v14 = vand.u32 4294901760, %v26_v10  ;;  %v55_v15 = vand.u32 4294901760, %v27_v11  ;;  %v28_v16 = vld [vmem:[%s3902_s3 + $0x30] sm:$0xff]  ;;  %v29_v17 = vld [vmem:[%s3902_s3 + $0x38] sm:$0xff] }
   0x4   :  { %v3398_v12 = vpack.c.bf16 %v43_v5, %v40_v4 }
   0x5   :  { %v3401_v13 = vpack.c.bf16 %v49_v9, %v46_v7 }
   0x6   :  { %2982 = vmatpush3.bf16.msra.mxu0 %v3398_v12 }
   0x7   :  { %2983 = vmatprep.subr.bf16.mxu0 %v3340_v3 }
   0x8   :  { %10 = vsyncpa [#allocation3], 0  ;;  %v3411_v18 = vpack.c.bf16 %v55_v15, %v52_v14  ;;  %v58_v19 = vand.u32 4294901760, %v28_v16  ;;  %v61_v20 = vand.u32 4294901760, %v29_v17  ;;  %v30_v21 = vld [vmem:[%s3902_s3 + $0x40] sm:$0xff]  ;;  %v31_v23 = vld [vmem:[%s3902_s3 + $0x48] sm:$0xff]  ;;  %v3449_v34 = vsub.f32 %v22_v0, %v40_v4 }
   0x9   :  { %v3419_v22 = vld [vmem:[%s3899_s0] sm:$0xf]  ;;  %v32_v24 = vld [vmem:[%s3902_s3 + $0x50] sm:$0xff]  ;;  %v33_v25 = vld [vmem:[%s3902_s3 + $0x58] sm:$0xff]  ;;  %v64_v27 = vand.u32 4294901760, %v30_v21  ;;  %v67_v33 = vand.u32 4294901760, %v31_v23  ;;  %v3451_v35 = vsub.f32 %v23_v1, %v43_v5  ;;  %v3458_v43 = vsub.f32 %v24_v2, %v46_v7 }
   0xa   :  { %2985 = vmatpush3.bf16.msra.mxu0 %v3401_v13  ;;  %v34_v26 = vld [vmem:[%s3902_s3 + $0x60] sm:$0xff]  ;;  %v35_v28 = vld [vmem:[%s3902_s3 + $0x68] sm:$0xff]  ;;  %v36_v29 = vld [vmem:[%s3902_s3 + $0x70] sm:$0xff]  ;;  %v3444_v31 = vand.u32 4294901760, %v3419_v22  ;;  %v3447_v32 = vpack.c.bf16 %v61_v20, %v58_v19  ;;  %v70_v36 = vand.u32 4294901760, %v32_v24  ;;  %v73_v37 = vand.u32 4294901760, %v33_v25 }
   0xb   :  { %2986 = vmatprep.subr.bf16.mxu0 %v3340_v3  ;;  %v37_v30 = vld [vmem:[%s3902_s3 + $0x78] sm:$0xff]  ;;  %v76_v38 = vand.u32 4294901760, %v34_v26  ;;  %v79_v39 = vand.u32 4294901760, %v35_v28  ;;  %v82_v40 = vand.u32 4294901760, %v36_v29  ;;  %v3460_v44 = vsub.f32 %v25_v6, %v49_v9  ;;  %s3343_s30 = smov [#allocation2]  }
   0xc   :  { %v85_v41 = vand.u32 4294901760, %v37_v30  ;;  %v3456_v42 = vsub.f32 %v3419_v22, %v3444_v31  ;;  %v3463_v45 = vpack.c.bf16 %v67_v33, %v64_v27  ;;  %v133_v46 = vand.u32 4294901760, %v3449_v34  ;;  %s2262_s6 = sshll.u32 %s3343_s30, 4  ;;  %s2263_s6 = int_to_ptr.vmem [resolvable:$true] %s2262_s6 }
   0xd   :  { %v140_v47 = vand.u32 4294901760, %v3451_v35  ;;  %v3467_v48 = vsub.f32 %v26_v10, %v52_v14  ;;  %v3470_v49 = vpack.c.bf16 %v73_v37, %v70_v36  ;;  %v3472_v50 = vpack.c.bf16 %v79_v39, %v76_v38  ;;  %s3316_s7 = scalar_lea.vmem %s2263_s6, 64  ;;  %p3321_p1 = scmp.lt.s32.totalorder %s2263_s6, %s2263_s6 }
   0xe   :  { %2988 = vmatpush3.bf16.msra.mxu0 %v3411_v18  ;;  %v3474_v51 = vpack.c.bf16 %v85_v41, %v82_v40  ;;  %v122_v52 = vand.u32 4294901760, %v3456_v42  ;;  %v147_v53 = vand.u32 4294901760, %v3458_v43  ;;  %v154_v54 = vand.u32 4294901760, %v3460_v44  ;;  %p3317_p0 = scmp.ne.s32.totalorder %s2263_s6, %s3316_s7  ;;  %p3322_p2 = scmp.lt.s32.totalorder %s3316_s7, %s3316_s7 }
   0xf   :  { %2989 = vmatprep.subr.bf16.mxu0 %v3340_v3  ;;  %v3479_v55 = vsub.f32 %v27_v11, %v55_v15  ;;  %v134_v56 = vsub.f32 %v3449_v34, %v133_v46  ;;  %v141_v57 = vsub.f32 %v3451_v35, %v140_v47  ;;  %v161_v58 = vand.u32 4294901760, %v3467_v48 }
  0x10   :  { %v3485_v59 = vsub.f32 %v28_v16, %v58_v19  ;;  %v3488_v60 = vsub.f32 %v29_v17, %v61_v20  ;;  %v3490_v61 = vsub.f32 %v30_v21, %v64_v27  ;;  %v3492_v62 = vsub.f32 %v31_v23, %v67_v33  ;;  %p3323_p3 = por %p3322_p2, %p3321_p1 }
  0x11   :  { %v3494_v63 = vsub.f32 %v32_v24, %v70_v36  ;;  %v3496_v0 = vsub.f32 %v33_v25, %v73_v37  ;;  %v3498_v1 = vsub.f32 %v34_v26, %v76_v38  ;;  %v3500_v2 = vsub.f32 %v35_v28, %v79_v39 }
  0x12   :  { %2991 = vmatpush3.bf16.msra.mxu0 %v3447_v32  ;;  %v3502_v4 = vsub.f32 %v36_v29, %v82_v40  ;;  %v123_v5 = vsub.f32 %v3456_v42, %v122_v52  ;;  %v148_v6 = vsub.f32 %v3458_v43, %v147_v53  ;;  %v168_v7 = vand.u32 4294901760, %v3479_v55  ;;  %p3324_p4 = pnand %p3323_p3, %p3317_p0 }
  0x13   :  { %2992 = vmatprep.subr.bf16.mxu0 %v3340_v3  ;;  %v3509_v9 = vsub.f32 %v37_v30, %v85_v41  ;;  %v135_v10 = vand.u32 4294901760, %v134_v56  ;;  %v142_v11 = vand.u32 4294901760, %v141_v57  ;;  %v155_v14 = vsub.f32 %v3460_v44, %v154_v54 }
  0x14   :  { %v175_v15 = vand.u32 4294901760, %v3485_v59  ;;  %v182_v16 = vand.u32 4294901760, %v3488_v60  ;;  %v189_v17 = vand.u32 4294901760, %v3490_v61  ;;  %v196_v19 = vand.u32 4294901760, %v3492_v62 }
  0x15   :  { %v203_v20 = vand.u32 4294901760, %v3494_v63  ;;  %v210_v21 = vand.u32 4294901760, %v3496_v0  ;;  %v217_v23 = vand.u32 4294901760, %v3498_v1  ;;  %v224_v24 = vand.u32 4294901760, %v3500_v2 }
  0x16   :  { %2994 = vmatpush3.bf16.msra.mxu0 %v3463_v45  ;;  %v231_v25 = vand.u32 4294901760, %v3502_v4  ;;  %v238_v26 = vand.u32 4294901760, %v3509_v9  ;;  %v3524_v27 = vpack.c.bf16 %v140_v47, %v133_v46  ;;  %v3526_v28 = vpack.c.bf16 %v154_v54, %v147_v53 }
  0x17   :  { %2995 = vmatprep.subr.bf16.mxu0 %v3340_v3  ;;  %v3528_v29 = vpack.c.bf16 %v168_v7, %v161_v58  ;;  %v3531_v30 = vpack.c.bf16 %v182_v16, %v175_v15  ;;  %v3533_v33 = vpack.c.bf16 %v196_v19, %v189_v17  ;;  %v3535_v36 = vpack.c.bf16 %v210_v21, %v203_v20 }
  0x18   :  { %v3537_v37 = vpack.c.bf16 %v224_v24, %v217_v23  ;;  %v3540_v38 = vpack.c.bf16 %v238_v26, %v231_v25  ;;  %v124_v39 = vand.u32 4294901760, %v123_v5  ;;  %v162_v40 = vsub.f32 %v3467_v48, %v161_v58 }
  0x19   :  { %v3544_v41 = vpack.c.bf16 %v142_v11, %v135_v10  ;;  %v149_v46 = vand.u32 4294901760, %v148_v6  ;;  %v156_v47 = vand.u32 4294901760, %v155_v14  ;;  %v169_v53 = vsub.f32 %v3479_v55, %v168_v7 }
  0x1a   :  { %2997 = vmatpush3.bf16.msra.mxu0 %v3470_v49  ;;  %v176_v54 = vsub.f32 %v3485_v59, %v175_v15  ;;  %v163_v57 = vand.u32 4294901760, %v162_v40  ;;  %v183_v58 = vsub.f32 %v3488_v60, %v182_v16  ;;  %v190_v11 = vsub.f32 %v3490_v61, %v189_v17 }
  0x1b   :  { %2998 = vmatprep.subr.bf16.mxu0 %v3340_v3  ;;  %v3550_v56 = vpack.c.bf16 %v156_v47, %v149_v46  ;;  %v170_v5 = vand.u32 4294901760, %v169_v53  ;;  %v197_v14 = vsub.f32 %v3492_v62, %v196_v19  ;;  %v204_v15 = vsub.f32 %v3494_v63, %v203_v20 }
  0x1c   :  { %v177_v6 = vand.u32 4294901760, %v176_v54  ;;  %v184_v10 = vand.u32 4294901760, %v183_v58  ;;  %v211_v46 = vsub.f32 %v3496_v0, %v210_v21  ;;  %v218_v47 = vsub.f32 %v3498_v1, %v217_v23 }
  0x1d   :  { %v3557_v7 = vpack.c.bf16 %v170_v5, %v163_v57  ;;  %v198_v40 = vand.u32 4294901760, %v197_v14  ;;  %v205_v19 = vand.u32 4294901760, %v204_v15  ;;  %v225_v20 = vsub.f32 %v3500_v2, %v224_v24 }
  0x1e   :  { %3000 = vmatpush3.bf16.msra.mxu0 %v3472_v50  ;;  %v3564_v16 = vpack.c.bf16 %v184_v10, %v177_v6  ;;  %v212_v53 = vand.u32 4294901760, %v211_v46  ;;  %v232_v54 = vsub.f32 %v3502_v4, %v231_v25  ;;  %v219_v21 = vand.u32 4294901760, %v218_v47 }
  0x1f   :  { %3001 = vmatprep.subr.bf16.mxu0 %v3340_v3  ;;  %v226_v5 = vand.u32 4294901760, %v225_v20  ;;  %v239_v23 = vsub.f32 %v3509_v9, %v238_v26  ;;  %v3591_v26 = vpack.c.bf16 %v3451_v35, %v3449_v34  ;;  %v3598_v10 = vpack.c.bf16 %v3460_v44, %v3458_v43 }
  0x20   :  { %v3576_v57 = vpack.c.bf16 %v212_v53, %v205_v19  ;;  %v233_v6 = vand.u32 4294901760, %v232_v54  ;;  %v3606_v34 = vpack.c.bf16 %v3479_v55, %v3467_v48  ;;  %v3612_v35 = vpack.c.bf16 %v3488_v60, %v3485_v59 }
  0x21   :  { %v3581_v58 = vpack.c.bf16 %v226_v5, %v219_v21  ;;  %v240_v24 = vand.u32 4294901760, %v239_v23  ;;  %v3618_v43 = vpack.c.bf16 %v3492_v62, %v3490_v61  ;;  %v3624_v44 = vpack.c.bf16 %v3496_v0, %v3494_v63 }
  0x22   :  { %3003 = vmatpush3.bf16.msra.mxu0 %v3474_v51  ;;  %v3630_v48 = vpack.c.bf16 %v3500_v2, %v3498_v1  ;;  %v3636_v55 = vpack.c.bf16 %v3509_v9, %v3502_v4  ;;  %vm685_vm1 = vcmask 1043456   ;;  %vm681_vm2 = vcmask 31744  }
  0x23   :  { %3004 = vmatprep.subr.bf16.mxu0 %v3340_v3  ;;  %v3585_v25 = vpack.c.bf16 %v240_v24, %v233_v6 }
  0x25   :  { %2533 = vmatmul.mubr.f32.vlgmr.msra.gmra.mrb[0].mxu0 %v124_v39  ;;  %v191_v39 = vand.u32 4294901760, %v190_v11 }
  0x26   :  { %3006 = vmatpush3.bf16.msra.mxu0 %v3544_v41  ;;  %2567 = vmatprep.mubr.msk.f32.mxu0 %vm3341_vm0, %v3342_v8 }
  0x27   :  { %3007 = vmatprep.subr.bf16.mxu0 %v3340_v3  ;;  %v3570_v17 = vpack.c.bf16 %v198_v40, %v191_v39 }
  0x2a   :  { %3009 = vmatpush3.bf16.msra.mxu0 %v3550_v56 }
  0x2b   :  { %3010 = vmatprep.subr.bf16.mxu0 %v3340_v3 }
  0x2e   :  { %3012 = vmatpush3.bf16.msra.mxu0 %v3557_v7 }
  0x2f   :  { %3013 = vmatprep.subr.bf16.mxu0 %v3340_v3 }
  0x32   :  { %3015 = vmatpush3.bf16.msra.mxu0 %v3564_v16 }
  0x33   :  { %3016 = vmatprep.subr.bf16.mxu0 %v3340_v3 }
  0x36   :  { %3018 = vmatpush3.bf16.msra.mxu0 %v3570_v17 }
  0x37   :  { %3019 = vmatprep.subr.bf16.mxu0 %v3340_v3 }
  0x3a   :  { %3021 = vmatpush3.bf16.msra.mxu0 %v3576_v57 }
  0x3b   :  { %3022 = vmatprep.subr.bf16.mxu0 %v3340_v3 }
  0x3e   :  { %3024 = vmatpush3.bf16.msra.mxu0 %v3581_v58 }
  0x3f   :  { %3025 = vmatprep.subr.bf16.mxu0 %v3340_v3 }
  0x42   :  { %3027 = vmatpush3.bf16.msra.mxu0 %v3585_v25 }
  0x43   :  { %3028 = vmatprep.subr.bf16.mxu0 %v3340_v3 }
  0x45   :  { %2568 = vmatmul.mubr.f32.vlgmr.msra.gmra.mrb[0].mxu0 %v3444_v31 }
  0x46   :  { %3030 = vmatpush3.bf16.msra.mxu0 %v3591_v26  ;;  %2602 = vmatprep.mubr.msk.f32.mxu0 %vm3341_vm0, %v3342_v8 }
  0x47   :  { %3031 = vmatprep.subr.bf16.mxu0 %v3340_v3 }
  0x4a   :  { %3033 = vmatpush3.bf16.msra.mxu0 %v3598_v10 }
  0x4b   :  { %3034 = vmatprep.subr.bf16.mxu0 %v3340_v3 }
  0x4e   :  { %3036 = vmatpush3.bf16.msra.mxu0 %v3606_v34 }
  0x4f   :  { %3037 = vmatprep.subr.bf16.mxu0 %v3340_v3 }
  0x52   :  { %3039 = vmatpush3.bf16.msra.mxu0 %v3612_v35 }
  0x53   :  { %3040 = vmatprep.subr.bf16.mxu0 %v3340_v3 }
  0x56   :  { %3042 = vmatpush3.bf16.msra.mxu0 %v3618_v43 }
  0x57   :  { %3043 = vmatprep.subr.bf16.mxu0 %v3340_v3 }
  0x5a   :  { %3045 = vmatpush3.bf16.msra.mxu0 %v3624_v44 }
  0x5b   :  { %3046 = vmatprep.subr.bf16.mxu0 %v3340_v3 }
  0x5e   :  { %3048 = vmatpush3.bf16.msra.mxu0 %v3630_v48 }
  0x5f   :  { %3049 = vmatprep.subr.bf16.mxu0 %v3340_v3 }
  0x62   :  { %3051 = vmatpush3.bf16.msra.mxu0 %v3636_v55 }
  0x63   :  { %3052 = vmatprep.subr.bf16.mxu0 %v3340_v3 }
  0x65   :  { %2603 = vmatmul.mubr.f32.vlgmr.msra.gmra.mrb[0].mxu0 %v3456_v42  ;;  %v38_v42 = vld [vmem:[%s3903_s4] sm:$0xf] }
  0x66   :  { %3054 = vmatpush3.bf16.msra.mxu0 %v3398_v12  ;;  %2637 = vmatprep.mubr.msk.f32.mxu0 %vm3341_vm0, %v3342_v8 }
  0x67   :  { %3055 = vmatprep.subr.bf16.mxu0 %v3340_v3 }
  0x6a   :  { %3057 = vmatpush3.bf16.msra.mxu0 %v3401_v13 }
  0x6b   :  { %3058 = vmatprep.subr.bf16.mxu0 %v3340_v3 }
  0x6e   :  { %3060 = vmatpush3.bf16.msra.mxu0 %v3411_v18 }
  0x6f   :  { %3061 = vmatprep.subr.bf16.mxu0 %v3340_v3 }
  0x72   :  { %3063 = vmatpush3.bf16.msra.mxu0 %v3447_v32 }
  0x73   :  { %3064 = vmatprep.subr.bf16.mxu0 %v3340_v3 }
  0x76   :  { %3066 = vmatpush3.bf16.msra.mxu0 %v3463_v45 }
  0x77   :  { %3067 = vmatprep.subr.bf16.mxu0 %v3340_v3 }
  0x7a   :  { %3069 = vmatpush3.bf16.msra.mxu0 %v3470_v49 }
  0x7b   :  { %3070 = vmatprep.subr.bf16.mxu0 %v3340_v3 }
  0x7e   :  { %3072 = vmatpush3.bf16.msra.mxu0 %v3472_v50 }
  0x7f   :  { %3073 = vmatprep.subr.bf16.mxu0 %v3340_v3 }
  0x82   :  { %3075 = vmatpush3.bf16.msra.mxu0 %v3474_v51 }
  0x83   :  { %3076 = vmatprep.subr.bf16.mxu0 %v3340_v3 }
  0x85   :  { %2638 = vmatmul.mubr.f32.vlgmr.msra.gmra.mrb[0].mxu0 %v122_v52  ;;  %v687_v52 = vsel %vm685_vm1, %v38_v42, 0 }
  0x86   :  { %3078 = vmatpush3.bf16.msra.mxu0 %v3524_v27  ;;  %2672 = vmatprep.mubr.msk.f32.mxu0 %vm3341_vm0, %v3342_v8  ;;  %v3705_v59 = vand.u32 4294901760, %v687_v52 }
  0x87   :  { %3079 = vmatprep.subr.bf16.mxu0 %v3340_v3 }
  0x88   :  { %2711 = vmatpush3.msra.mxu1 %v3705_v59 }
  0x89   :  { %2715 = vmatprep.subr.mxu1 %v3342_v8 }
  0x8a   :  { %3081 = vmatpush3.bf16.msra.mxu0 %v3526_v28 }
  0x8b   :  { %3082 = vmatprep.subr.bf16.mxu0 %v3340_v3 }
  0x8e   :  { %3084 = vmatpush3.bf16.msra.mxu0 %v3528_v29 }
  0x8f   :  { %3085 = vmatprep.subr.bf16.mxu0 %v3340_v3 }
  0x92   :  { %3087 = vmatpush3.bf16.msra.mxu0 %v3531_v30 }
  0x93   :  { %3088 = vmatprep.subr.bf16.mxu0 %v3340_v3 }
  0x96   :  { %3090 = vmatpush3.bf16.msra.mxu0 %v3533_v33 }
  0x97   :  { %3091 = vmatprep.subr.bf16.mxu0 %v3340_v3 }
  0x9a   :  { %3093 = vmatpush3.bf16.msra.mxu0 %v3535_v36 }
  0x9b   :  { %3094 = vmatprep.subr.bf16.mxu0 %v3340_v3 }
  0x9e   :  { %3096 = vmatpush3.bf16.msra.mxu0 %v3537_v37 }
  0x9f   :  { %3097 = vmatprep.subr.bf16.mxu0 %v3340_v3 }
  0xa2   :  { %3099 = vmatpush3.bf16.msra.mxu0 %v3540_v38 }
  0xa3   :  { %3100 = vmatprep.subr.bf16.mxu0 %v3340_v3 }
  0xa5   :  { %2673 = vmatmul.mubr.f32.vlgmr.msra.gmra.mrb[0].mxu0 %v3444_v31 }
  0xa6   :  { %3102 = vmatpush3.bf16.msra.mxu0 %v3398_v12  ;;  %2707 = vmatprep.mubr.msk.f32.mxu0 %vm3341_vm0, %v3342_v8 }
  0xa7   :  { %3103 = vmatprep.subr.bf16.mxu0 %v3340_v3 }
  0xaa   :  { %3105 = vmatpush3.bf16.msra.mxu0 %v3401_v13 }
  0xab   :  { %3106 = vmatprep.subr.bf16.mxu0 %v3340_v3 }
  0xae   :  { %3108 = vmatpush3.bf16.msra.mxu0 %v3411_v18 }
  0xaf   :  { %3109 = vmatprep.subr.bf16.mxu0 %v3340_v3 }
  0xb2   :  { %3111 = vmatpush3.bf16.msra.mxu0 %v3447_v32 }
  0xb3   :  { %3112 = vmatprep.subr.bf16.mxu0 %v3340_v3 }
  0xb6   :  { %3114 = vmatpush3.bf16.msra.mxu0 %v3463_v45 }
  0xb7   :  { %3115 = vmatprep.subr.bf16.mxu0 %v3340_v3 }
  0xba   :  { %3117 = vmatpush3.bf16.msra.mxu0 %v3470_v49 }
  0xbb   :  { %3118 = vmatprep.subr.bf16.mxu0 %v3340_v3 }
  0xbe   :  { %3120 = vmatpush3.bf16.msra.mxu0 %v3472_v50 }
  0xbf   :  { %3121 = vmatprep.subr.bf16.mxu0 %v3340_v3 }
  0xc2   :  { %3123 = vmatpush3.bf16.msra.mxu0 %v3474_v51 }
  0xc3   :  { %2950 = vmatprep.subr.mxu0 %v3342_v8 }
  0xc5   :  { %2708 = vmatmul.mubr.f32.vlgmr.msra.gmra.mrb[0].mxu0 %v3444_v31  ;;  %v3712_v31 = vsub.f32 %v687_v52, %v3705_v59 }
  0xc6   :  { %2952 = vmatprep.mubr.msk.f32.mxu0 %vm3341_vm0, %v3342_v8  ;;  %2951 = vmatpush3.msra.mxu0 %v3705_v59 }
  0xc7   :  { %2955 = vmatprep.subr.mxu0 %v3342_v8  ;;  %v3716_v0 = vand.u32 4294901760, %v3712_v31 }
  0xc9   :  { %v769_v4 = vsub.f32 %v3712_v31, %v3716_v0 }
  0xcb   :  { %v3720_v14 = vand.u32 4294901760, %v769_v4 }
 0x198   :  { %v676_v60 = vpop.f32.mrb[0].mxu0 }
 0x199   :  { %v680_v61 = vmul.f32 0.03125, %v676_v60  ;;  %v2709_v62 = vpop.f32.mrb[1].mxu0 }
 0x19b   :  { %v683_v63 = vsel %vm681_vm2, %v680_v61, 0 }
 0x19c   :  { %v755_v1 = vand.u32 4294901760, %v683_v63 }
 0x19e   :  { %v756_v2 = vsub.f32 %v683_v63, %v755_v1 }
 0x1a0   :  { %v757_v9 = vand.u32 4294901760, %v756_v2 }
 0x1a2   :  { %v758_v11 = vsub.f32 %v756_v2, %v757_v9 }
 0x1a4   :  { %v759_v15 = vand.u32 4294901760, %v758_v11 }
 0x1a6   :  { %2713 = vmatmul.mubr.f32.vlgmr.msra.gmra.mrb[0].mxu1 %v759_v15 }
 0x1a7   :  { %2716 = vmatpush3.msra.mxu1 %v3720_v14  ;;  %2717 = vmatprep.mubr.msk.f32.mxu1 %vm3341_vm0, %v3342_v8 }
 0x1a8   :  { %2720 = vmatprep.subr.mxu1 %v3342_v8 }
 0x1ae   :  { %2718 = vmatmul.mubr.f32.vlgmr.msra.gmra.mrb[0].mxu1 %v755_v1 }
 0x1af   :  { %2721 = vmatpush3.msra.mxu1 %v3712_v31  ;;  %2722 = vmatprep.mubr.msk.f32.mxu1 %vm3341_vm0, %v3342_v8 }
 0x1b0   :  { %2725 = vmatprep.subr.mxu1 %v3342_v8 }
 0x1b6   :  { %2723 = vmatmul.mubr.f32.vlgmr.msra.gmra.mrb[0].mxu1 %v756_v2 }
 0x1b7   :  { %2726 = vmatpush3.msra.mxu1 %v3705_v59  ;;  %2727 = vmatprep.mubr.msk.f32.mxu1 %vm3341_vm0, %v3342_v8 }
 0x1b8   :  { %2730 = vmatprep.subr.mxu1 %v3342_v8 }
 0x1be   :  { %2728 = vmatmul.mubr.f32.vlgmr.msra.gmra.mrb[0].mxu1 %v757_v9 }
 0x1bf   :  { %2731 = vmatpush3.msra.mxu1 %v3716_v0  ;;  %2732 = vmatprep.mubr.msk.f32.mxu1 %vm3341_vm0, %v3342_v8 }
 0x1c0   :  { %2735 = vmatprep.subr.mxu1 %v3342_v8 }
 0x1c6   :  { %2733 = vmatmul.mubr.f32.vlgmr.msra.gmra.mrb[0].mxu1 %v755_v1 }
 0x1c7   :  { %2736 = vmatpush3.msra.mxu1 %v3705_v59  ;;  %2737 = vmatprep.mubr.msk.f32.mxu1 %vm3341_vm0, %v3342_v8 }
 0x1c8   :  { %3124 = vmatprep.subr.bf16.mxu1 %v3340_v3 }
 0x1ce   :  { %2738 = vmatmul.mubr.f32.vlgmr.msra.gmra.mrb[0].mxu1 %v755_v1 }
 0x1cf   :  { %3126 = vmatpush3.bf16.msra.mxu1 %v3398_v12  ;;  %2772 = vmatprep.mubr.msk.f32.mxu1 %vm3341_vm0, %v3342_v8 }
 0x1d0   :  { %3127 = vmatprep.subr.bf16.mxu1 %v3340_v3 }
 0x1d3   :  { %3129 = vmatpush3.bf16.msra.mxu1 %v3401_v13 }
 0x1d4   :  { %3130 = vmatprep.subr.bf16.mxu1 %v3340_v3 }
 0x1d7   :  { %3132 = vmatpush3.bf16.msra.mxu1 %v3411_v18 }
 0x1d8   :  { %3133 = vmatprep.subr.bf16.mxu1 %v3340_v3 }
 0x1db   :  { %3135 = vmatpush3.bf16.msra.mxu1 %v3447_v32 }
 0x1dc   :  { %3136 = vmatprep.subr.bf16.mxu1 %v3340_v3 }
 0x1df   :  { %3138 = vmatpush3.bf16.msra.mxu1 %v3463_v45 }
 0x1e0   :  { %3139 = vmatprep.subr.bf16.mxu1 %v3340_v3 }
 0x1e3   :  { %3141 = vmatpush3.bf16.msra.mxu1 %v3470_v49 }
 0x1e4   :  { %3142 = vmatprep.subr.bf16.mxu1 %v3340_v3 }
 0x1e7   :  { %3144 = vmatpush3.bf16.msra.mxu1 %v3472_v50 }
 0x1e8   :  { %3145 = vmatprep.subr.bf16.mxu1 %v3340_v3 }
 0x1eb   :  { %3147 = vmatpush3.bf16.msra.mxu1 %v3474_v51 }
 0x1ec   :  { %3148 = vmatprep.subr.bf16.mxu1 %v3340_v3 }
 0x2a1   :  { %v1131_v39 = vpop.f32.mrb[0].mxu1 }
 0x2a2   :  { %v3761_v40 = vsub.f32 %v3419_v22, %v1131_v39  ;;  %v2739_v46 = vpop.f32.mrb[1].mxu1 }
 0x2a4   :  { %v1136_v47 = vmul.f32 %v3761_v40, %v3761_v40 }
 0x2a6   :  { %v3765_v19 = vand.u32 4294901760, %v1136_v47 }
 0x2a8   :  { %v1219_v53 = vsub.f32 %v1136_v47, %v3765_v19 }
 0x2aa   :  { %v1220_v20 = vand.u32 4294901760, %v1219_v53 }
 0x2ac   :  { %v1221_v54 = vsub.f32 %v1219_v53, %v1220_v20 }
 0x2ae   :  { %v1222_v21 = vand.u32 4294901760, %v1221_v54 }
 0x2b0   :  { %2773 = vmatmul.mubr.f32.vlgmr.msra.gmra.mrb[2].mxu1 %v1222_v21 }
 0x2b1   :  { %3150 = vmatpush3.bf16.msra.mxu1 %v3544_v41  ;;  %2807 = vmatprep.mubr.msk.f32.mxu1 %vm3341_vm0, %v3342_v8 }
 0x2b2   :  { %3151 = vmatprep.subr.bf16.mxu1 %v3340_v3 }
 0x2b5   :  { %3153 = vmatpush3.bf16.msra.mxu1 %v3550_v56 }
 0x2b6   :  { %3154 = vmatprep.subr.bf16.mxu1 %v3340_v3 }
 0x2b9   :  { %3156 = vmatpush3.bf16.msra.mxu1 %v3557_v7  ;;  %v2271_v7 = vld [vmem:[%s3901_s2] ss:$0 sm:$0xff] }
 0x2ba   :  { %3157 = vmatprep.subr.bf16.mxu1 %v3340_v3 }
 0x2bd   :  { %3159 = vmatpush3.bf16.msra.mxu1 %v3564_v16 }
 0x2be   :  { %3160 = vmatprep.subr.bf16.mxu1 %v3340_v3 }
 0x2c1   :  { %3162 = vmatpush3.bf16.msra.mxu1 %v3570_v17 }
 0x2c2   :  { %3163 = vmatprep.subr.bf16.mxu1 %v3340_v3 }
 0x2c5   :  { %3165 = vmatpush3.bf16.msra.mxu1 %v3576_v57 }
 0x2c6   :  { %3166 = vmatprep.subr.bf16.mxu1 %v3340_v3 }
 0x2c9   :  { %3168 = vmatpush3.bf16.msra.mxu1 %v3581_v58 }
 0x2ca   :  { %3169 = vmatprep.subr.bf16.mxu1 %v3340_v3 }
 0x2cd   :  { %3171 = vmatpush3.bf16.msra.mxu1 %v3585_v25 }
 0x2ce   :  { %3172 = vmatprep.subr.bf16.mxu1 %v3340_v3 }
 0x2d0   :  { %2808 = vmatmul.mubr.f32.vlgmr.msra.gmra.mrb[2].mxu1 %v3765_v19 }
 0x2d1   :  { %3174 = vmatpush3.bf16.msra.mxu1 %v3591_v26  ;;  %2842 = vmatprep.mubr.msk.f32.mxu1 %vm3341_vm0, %v3342_v8 }
 0x2d2   :  { %3175 = vmatprep.subr.bf16.mxu1 %v3340_v3 }
 0x2d5   :  { %3177 = vmatpush3.bf16.msra.mxu1 %v3598_v10 }
 0x2d6   :  { %3178 = vmatprep.subr.bf16.mxu1 %v3340_v3 }
 0x2d9   :  { %3180 = vmatpush3.bf16.msra.mxu1 %v3606_v34 }
 0x2da   :  { %3181 = vmatprep.subr.bf16.mxu1 %v3340_v3 }
 0x2dd   :  { %3183 = vmatpush3.bf16.msra.mxu1 %v3612_v35 }
 0x2de   :  { %3184 = vmatprep.subr.bf16.mxu1 %v3340_v3 }
 0x2e1   :  { %3186 = vmatpush3.bf16.msra.mxu1 %v3618_v43 }
 0x2e2   :  { %3187 = vmatprep.subr.bf16.mxu1 %v3340_v3 }
 0x2e5   :  { %3189 = vmatpush3.bf16.msra.mxu1 %v3624_v44 }
 0x2e6   :  { %3190 = vmatprep.subr.bf16.mxu1 %v3340_v3 }
 0x2e9   :  { %3192 = vmatpush3.bf16.msra.mxu1 %v3630_v48 }
 0x2ea   :  { %3193 = vmatprep.subr.bf16.mxu1 %v3340_v3 }
 0x2ed   :  { %3195 = vmatpush3.bf16.msra.mxu1 %v3636_v55 }
 0x2ee   :  { %3196 = vmatprep.subr.bf16.mxu1 %v3340_v3 }
 0x2f0   :  { %2843 = vmatmul.mubr.f32.vlgmr.msra.gmra.mrb[2].mxu1 %v1219_v53 }
 0x2f1   :  { %3198 = vmatpush3.bf16.msra.mxu1 %v3398_v12  ;;  %2877 = vmatprep.mubr.msk.f32.mxu1 %vm3341_vm0, %v3342_v8 }
 0x2f2   :  { %3199 = vmatprep.subr.bf16.mxu1 %v3340_v3 }
 0x2f5   :  { %3201 = vmatpush3.bf16.msra.mxu1 %v3401_v13 }
 0x2f6   :  { %3202 = vmatprep.subr.bf16.mxu1 %v3340_v3 }
 0x2f9   :  { %3204 = vmatpush3.bf16.msra.mxu1 %v3411_v18 }
 0x2fa   :  { %3205 = vmatprep.subr.bf16.mxu1 %v3340_v3 }
 0x2fd   :  { %3207 = vmatpush3.bf16.msra.mxu1 %v3447_v32 }
 0x2fe   :  { %3208 = vmatprep.subr.bf16.mxu1 %v3340_v3 }
 0x301   :  { %3210 = vmatpush3.bf16.msra.mxu1 %v3463_v45 }
 0x302   :  { %3211 = vmatprep.subr.bf16.mxu1 %v3340_v3 }
 0x305   :  { %3213 = vmatpush3.bf16.msra.mxu1 %v3470_v49 }
 0x306   :  { %3214 = vmatprep.subr.bf16.mxu1 %v3340_v3 }
 0x309   :  { %3216 = vmatpush3.bf16.msra.mxu1 %v3472_v50 }
 0x30a   :  { %3217 = vmatprep.subr.bf16.mxu1 %v3340_v3 }
 0x30d   :  { %3219 = vmatpush3.bf16.msra.mxu1 %v3474_v51 }
 0x30e   :  { %3220 = vmatprep.subr.bf16.mxu1 %v3340_v3 }
 0x310   :  { %2878 = vmatmul.mubr.f32.vlgmr.msra.gmra.mrb[2].mxu1 %v1220_v20 }
 0x311   :  { %3222 = vmatpush3.bf16.msra.mxu1 %v3524_v27  ;;  %2912 = vmatprep.mubr.msk.f32.mxu1 %vm3341_vm0, %v3342_v8 }
 0x312   :  { %3223 = vmatprep.subr.bf16.mxu1 %v3340_v3 }
 0x315   :  { %3225 = vmatpush3.bf16.msra.mxu1 %v3526_v28 }
 0x316   :  { %3226 = vmatprep.subr.bf16.mxu1 %v3340_v3 }
 0x319   :  { %3228 = vmatpush3.bf16.msra.mxu1 %v3528_v29 }
 0x31a   :  { %3229 = vmatprep.subr.bf16.mxu1 %v3340_v3 }
 0x31d   :  { %3231 = vmatpush3.bf16.msra.mxu1 %v3531_v30 }
 0x31e   :  { %3232 = vmatprep.subr.bf16.mxu1 %v3340_v3 }
 0x321   :  { %3234 = vmatpush3.bf16.msra.mxu1 %v3533_v33 }
 0x322   :  { %3235 = vmatprep.subr.bf16.mxu1 %v3340_v3 }
 0x325   :  { %3237 = vmatpush3.bf16.msra.mxu1 %v3535_v36 }
 0x326   :  { %3238 = vmatprep.subr.bf16.mxu1 %v3340_v3 }
 0x329   :  { %3240 = vmatpush3.bf16.msra.mxu1 %v3537_v37 }
 0x32a   :  { %3241 = vmatprep.subr.bf16.mxu1 %v3340_v3 }
 0x32d   :  { %3243 = vmatpush3.bf16.msra.mxu1 %v3540_v38  ;;  %v2270_v38 = vld [vmem:[%s3900_s1] ss:$0 sm:$0xff] }
 0x32e   :  { %3244 = vmatprep.subr.bf16.mxu1 %v3340_v3 }
 0x330   :  { %2913 = vmatmul.mubr.f32.vlgmr.msra.gmra.mrb[2].mxu1 %v3765_v19 }
 0x331   :  { %3246 = vmatpush3.bf16.msra.mxu1 %v3398_v12  ;;  %2947 = vmatprep.mubr.msk.f32.mxu1 %vm3341_vm0, %v3342_v8 }
 0x332   :  { %3247 = vmatprep.subr.bf16.mxu1 %v3340_v3 }
 0x335   :  { %3249 = vmatpush3.bf16.msra.mxu1 %v3401_v13 }
 0x336   :  { %3250 = vmatprep.subr.bf16.mxu1 %v3340_v3 }
 0x339   :  { %3252 = vmatpush3.bf16.msra.mxu1 %v3411_v18 }
 0x33a   :  { %3253 = vmatprep.subr.bf16.mxu1 %v3340_v3 }
 0x33d   :  { %3255 = vmatpush3.bf16.msra.mxu1 %v3447_v32 }
 0x33e   :  { %3256 = vmatprep.subr.bf16.mxu1 %v3340_v3 }
 0x341   :  { %3258 = vmatpush3.bf16.msra.mxu1 %v3463_v45 }
 0x342   :  { %3259 = vmatprep.subr.bf16.mxu1 %v3340_v3 }
 0x345   :  { %3261 = vmatpush3.bf16.msra.mxu1 %v3470_v49 }
 0x346   :  { %3262 = vmatprep.subr.bf16.mxu1 %v3340_v3 }
 0x349   :  { %3264 = vmatpush3.bf16.msra.mxu1 %v3472_v50 }
 0x34a   :  { %3265 = vmatprep.subr.bf16.mxu1 %v3340_v3 }
 0x34d   :  { %3267 = vmatpush3.bf16.msra.mxu1 %v3474_v51 }
 0x350   :  { %2948 = vmatmul.mubr.f32.vlgmr.msra.gmra.mrb[2].mxu1 %v3765_v19 }
 0x423   :  { %v1774_v12 = vpop.f32.mrb[2].mxu1 }
 0x424   :  { %v1778_v13 = vmul.f32 0.032258064, %v1774_v12  ;;  %v2949_v18 = vpop.f32.mrb[3].mxu1 }
 0x426   :  { %3312 = vrsqrt.f32 %v1778_v13  ;;  %vm1781_vm3 = vcmp.eq.f32.partialorder %v1778_v13, inf  ;;  %v1784_v45 = vand.u32 2147483648, %v1778_v13  ;;  %vm1783_vm4 = vcmp.eq.f32.partialorder %v1778_v13, 0.0 }
 0x430   :  { %v3313_v22 = vpop.eup %3312 }
 0x431   :  { %v1780_v32 = vmul.f32 %v3313_v22, %v1778_v13 }
 0x433   :  { %v1782_v27 = vsel %vm1781_vm3, %v1778_v13, %v1780_v32 }
 0x434   :  { %v1785_v49 = vsel %vm1783_vm4, %v1784_v45, %v1782_v27 }
 0x435   :  { %v1786_v28 = vadd.f32 1e-06, %v1785_v49 }
 0x437   :  { %3314 = vrcp.f32 %v1786_v28 }
 0x441   :  { %v3315_v50 = vpop.eup %3314 }
 0x442   :  { %v1790_v3 = vsel %vm681_vm2, %v3315_v50, 0 }
 0x443   :  { %v1858_v29 = vand.u32 4294901760, %v1790_v3 }
 0x445   :  { %v1859_v51 = vsub.f32 %v1790_v3, %v1858_v29 }
 0x447   :  { %v1860_v30 = vand.u32 4294901760, %v1859_v51 }
 0x449   :  { %v1861_v33 = vsub.f32 %v1859_v51, %v1860_v30 }
 0x44b   :  { %v1862_v36 = vand.u32 4294901760, %v1861_v33 }
 0x44d   :  { %2953 = vmatmul.mubr.f32.vlgmr.msra.gmra.mrb[2].mxu0 %v1862_v36 }
 0x44e   :  { %2956 = vmatpush3.msra.mxu0 %v3720_v14  ;;  %2957 = vmatprep.mubr.msk.f32.mxu0 %vm3341_vm0, %v3342_v8 }
 0x44f   :  { %2960 = vmatprep.subr.mxu0 %v3342_v8 }
 0x455   :  { %2958 = vmatmul.mubr.f32.vlgmr.msra.gmra.mrb[2].mxu0 %v1858_v29 }
 0x456   :  { %2961 = vmatpush3.msra.mxu0 %v3712_v31  ;;  %2962 = vmatprep.mubr.msk.f32.mxu0 %vm3341_vm0, %v3342_v8 }
 0x457   :  { %2965 = vmatprep.subr.mxu0 %v3342_v8 }
 0x45d   :  { %2963 = vmatmul.mubr.f32.vlgmr.msra.gmra.mrb[2].mxu0 %v1859_v51 }
 0x45e   :  { %2966 = vmatpush3.msra.mxu0 %v3705_v59  ;;  %2967 = vmatprep.mubr.msk.f32.mxu0 %vm3341_vm0, %v3342_v8 }
 0x45f   :  { %2970 = vmatprep.subr.mxu0 %v3342_v8 }
 0x465   :  { %2968 = vmatmul.mubr.f32.vlgmr.msra.gmra.mrb[2].mxu0 %v1860_v30 }
 0x466   :  { %2971 = vmatpush3.msra.mxu0 %v3716_v0  ;;  %2972 = vmatprep.mubr.msk.f32.mxu0 %vm3341_vm0, %v3342_v8 }
 0x467   :  { %2975 = vmatprep.subr.mxu0 %v3342_v8 }
 0x46d   :  { %2973 = vmatmul.mubr.f32.vlgmr.msra.gmra.mrb[2].mxu0 %v1858_v29 }
 0x46e   :  { %2976 = vmatpush3.msra.mxu0 %v3705_v59  ;;  %2977 = vmatprep.mubr.msk.f32.mxu0 %vm3341_vm0, %v3342_v8 }
 0x475   :  { %2978 = vmatmul.mubr.f32.vlgmr.msra.gmra.mrb[2].mxu0 %v1858_v29 }
 0x548   :  { %v2234_v37 = vpop.f32.mrb[2].mxu0 }
 0x549   :  { %v2240_v41 = vmul.f32 %v2234_v37, %v3761_v40  ;;  %v2979_v56 = vpop.f32.mrb[3].mxu0 }
 0x54b   :  { %v2247_v16 = vmul.f32 %v2270_v38, %v2240_v41 }
 0x54d   :  { %v2254_v17 = vadd.f32 %v2271_v7, %v2247_v16 }
 0x54f   :  { %2255 = vst [vmem:[#allocation2] sm:$0xf] %v2254_v17 }
 0x550   :  { %3327 = shalt.err (!%p3324_p4)
}
 0x551   :  { %s3328_s9 = scalar_lea.hbm %s3904_s5, 64 }
 0x552   :  { %p3329_p5 = scmp.ne.s32.totalorder %s3904_s5, %s3328_s9  ;;  %p3332_p6 = scmp.lt.u32.totalorder %s3328_s9, %s3904_s5 }
 0x554   :  { %p3334_p7 = pnand %p3332_p6, %p3329_p5 }
 0x556   :  { %3337 = shalt.err (!%p3334_p7)
}
 0x557   :  { %2265 = dma.vmem_to_hbm [thread:$0]  %s2263_s6, 64, %s3904_s5, [#allocation3]  }
 0x558   :  { %3338 = dma.done.wait [#allocation3], 64  }
 0x559   :  { %3339 = vsyncadd [#allocation3], 4294967232 }
 0x55a   :  { %2269 = vsyncpa [#allocation3], 1 }

</bundles_post_ra>
